<compile_context>
chip_gen: v5e
topology: v5e:2x2
jax: 0.10.0
libtpu: 0.0.40
codegen_flags: <defaults>
</compile_context>

<pallas_src>
import functools

import jax
import jax.numpy as jnp
from jax import lax
from jax.experimental import pallas as pl
from jax.experimental.pallas import tpu as pltpu

LANE = 128      # vreg lane width (last dim)
SUBLANE = 8     # vreg sublane width (second-to-last dim)


def _cdiv(a: int, b: int) -> int:
    return -(-a // b)


def _round_up(x: int, m: int) -> int:
    return _cdiv(x, m) * m


# ----------------------------------------------------------------------------
# Kernel
# ----------------------------------------------------------------------------
def _actor_kernel(action_dims, s_dims,
                  state_ref,
                  w1_ref, b1_ref,
                  w2_ref, b2_ref,
                  wh_ref, bh_ref,
                  out_ref,
                  xpad_ref):
    """One batch tile: two hidden layers + fused (mu|log_std) head.

    out columns [0, A)    : mu
    out columns [A, 2A)   : std = exp(clip(log_std, -20, 2))
    out columns [2A, 128) : padding junk (sliced off in the wrapper)
    """
    cdt = xpad_ref.dtype                 # MXU operand dtype (f32 or bf16)
    s_pad = xpad_ref.shape[1]

    # The state streams from HBM at its true width (s_dims lanes).  Lane-pad
    # it to 128 inside VMEM (cheap vreg stores) instead of materialising a
    # padded copy in HBM.  Zeroing first keeps the pad lanes finite; the
    # matching rows of w1 are zero, so they contribute nothing to the matmul.
    if s_dims < s_pad:
        xpad_ref[...] = jnp.zeros(xpad_ref.shape, cdt)
        xpad_ref[:, :s_dims] = state_ref[...].astype(cdt)
        x = xpad_ref[...]
    else:
        x = state_ref[...].astype(cdt)

    # Layer 1 + ReLU (MXU matmul, f32 accumulation; bias add in f32).
    h1 = jnp.dot(x, w1_ref[...].astype(cdt),
                 preferred_element_type=jnp.float32) + b1_ref[...]
    h1 = jnp.maximum(h1, 0.0).astype(cdt)

    # Layer 2 + ReLU.
    h2 = jnp.dot(h1, w2_ref[...].astype(cdt),
                 preferred_element_type=jnp.float32) + b2_ref[...]
    h2 = jnp.maximum(h2, 0.0).astype(cdt)

    # Fused head: one matmul produces [mu | log_std | pad] in a lane-dense slab.
    head = jnp.dot(h2, wh_ref[...].astype(cdt),
                   preferred_element_type=jnp.float32) + bh_ref[...]

    # Apply clip+exp only to the log_std columns (EUP op + full-vreg select).
    col = lax.broadcasted_iota(jnp.int32, head.shape, 1)
    std = jnp.exp(jnp.clip(head, -20.0, 2.0))
    out = jnp.where(col >= action_dims, std, head)

    # TODO(synk): for the per-env-step SAC inference path the sampling epilogue
    # (eps = pltpu.prng_random_bits; action = tanh(mu + std*eps)) could be fused
    # here to save a dispatch + slab round trip, but that changes the module's
    # forward() semantics (returns mu, std), so it is intentionally left out.
    out_ref[...] = out.astype(out_ref.dtype)


# ----------------------------------------------------------------------------
# Wrapper
# ----------------------------------------------------------------------------
def actor_policy_forward(state, params, *, action_dims, tile_b=1024,
                         out_dtype=jnp.float32, act_dtype=None):
    """state: [B, state_dims]; params: padded/fused dict from pack_params.

    Returns (mu, std), each [B, action_dims] in `out_dtype`.

    dtype guidance:
      * v6e / v7x : pack_params(param_dtype=bf16); optionally pass bf16 state
        and out_dtype=bf16 to halve every HBM stream (accumulation stays f32).
      * v5e       : pass act_dtype=jnp.float32 (no bf16 VALU on v5e); bf16
        weights alone are still fine (upcast once per tile inside VMEM).
    """
    B, s_dims = state.shape
    S_pad, H_pad = params["w1"].shape
    OUT_pad = params["w_head"].shape[1]
    assert s_dims <= S_pad and 2 * action_dims <= OUT_pad

    compute_dtype = (jnp.dtype(act_dtype) if act_dtype is not None
                     else params["w1"].dtype)

    # ---- batch tiling -------------------------------------------------------
    tile_b = max(int(tile_b), SUBLANE)
    b_aligned = _round_up(max(B, SUBLANE), SUBLANE)
    n_tiles = _cdiv(b_aligned, tile_b)
    # v7x has 2 TensorCores: give the "parallel" batch axis >= 2 grid steps
    # once the batch is big enough that the split still amortises the ~0.35us
    # per-step overhead (one harmless extra step on single-TC v5e/v6e).
    if n_tiles == 1 and b_aligned >= 512:
        n_tiles = 2
    # Balanced tiles: don't round the batch up to a whole extra tile_b.
    tile_rows = _round_up(_cdiv(b_aligned, n_tiles), SUBLANE)
    B_pad = n_tiles * tile_rows

    # Row padding only (cheap, usually zero); feature lanes stay at s_dims so
    # the state read from HBM is not inflated 128/s_dims x.
    xp = state if B_pad == B else jnp.pad(state, ((0, B_pad - B), (0, 0)))

    # ---- specs --------------------------------------------------------------
    # Grid-invariant weights/biases: single-buffer them once they are large
    # enough that default double buffering would threaten VMEM headroom
    # (matters if hidden_dim grows, esp. on v7x's 64 MiB VMEM; skipped — and
    # hence zero-risk — at small sizes like the test below).
    w_bytes = sum(params[k].size * params[k].dtype.itemsize
                  for k in ("w1", "w2", "w_head", "b1", "b2", "b_head"))
    single_buffer_weights = w_bytes > (8 << 20)

    def w_spec(rows, cols):
        if single_buffer_weights:
            return pl.BlockSpec((rows, cols), lambda i: (0, 0),
                                pipeline_mode=pl.Buffered(1))
        return pl.BlockSpec((rows, cols), lambda i: (0, 0))

    flops = 2 * B_pad * (S_pad * H_pad + H_pad * H_pad + H_pad * OUT_pad)
    bytes_accessed = (xp.size * xp.dtype.itemsize
                      + w_bytes
                      + B_pad * OUT_pad * jnp.dtype(out_dtype).itemsize)
    cost = pl.CostEstimate(flops=flops,
                           transcendentals=B_pad * OUT_pad,
                           bytes_accessed=bytes_accessed)

    kernel = functools.partial(_actor_kernel, action_dims, s_dims)

    out = pl.pallas_call(
        kernel,
        out_shape=jax.ShapeDtypeStruct((B_pad, OUT_pad), out_dtype),
        grid=(n_tiles,),
        in_specs=[
            # state tile: last block dim == full array dim (legal, lane-sparse read)
            pl.BlockSpec((tile_rows, s_dims), lambda i: (i, 0)),
            w_spec(S_pad, H_pad),    # w1 (VMEM-resident across grid steps)
            w_spec(1, H_pad),        # b1
            w_spec(H_pad, H_pad),    # w2
            w_spec(1, H_pad),        # b2
            w_spec(H_pad, OUT_pad),  # fused head weight [Wmu | Wsig]
            w_spec(1, OUT_pad),      # fused head bias
        ],
        out_specs=pl.BlockSpec((tile_rows, OUT_pad), lambda i: (i, 0)),
        scratch_shapes=[pltpu.VMEM((tile_rows, S_pad), compute_dtype)],
        compiler_params=pltpu.CompilerParams(
            dimension_semantics=("parallel",),  # batch tiles across v7x's 2 TCs
        ),
        cost_estimate=cost,
    )(xp,
      params["w1"], params["b1"],
      params["w2"], params["b2"],
      params["w_head"], params["b_head"])

    mu = out[:B, :action_dims]
    std = out[:B, action_dims:2 * action_dims]
    return mu, std


# ----------------------------------------------------------------------------
# Parameter construction
# ----------------------------------------------------------------------------
def init_raw_params(key, state_dims, hidden_dim, action_dims):
    """Unpadded params mimicking nn.Linear's U(-1/sqrt(fan_in), +1/sqrt(fan_in)).

    Weights are [in_features, out_features] (transposed vs. PyTorch storage).
    """
    def linear(k, fan_in, fan_out):
        kw, kb = jax.random.split(k)
        bound = 1.0 / jnp.sqrt(fan_in)
        w = jax.random.uniform(kw, (fan_in, fan_out), jnp.float32, -bound, bound)
        b = jax.random.uniform(kb, (fan_out,), jnp.float32, -bound, bound)
        return w, b

    k1, k2, k3, k4 = jax.random.split(key, 4)
    w1, b1 = linear(k1, state_dims, hidden_dim)
    w2, b2 = linear(k2, hidden_dim, hidden_dim)
    wmu, bmu = linear(k3, hidden_dim, action_dims)
    wsig, bsig = linear(k4, hidden_dim, action_dims)
    return dict(w1=w1, b1=b1, w2=w2, b2=b2,
                wmu=wmu, bmu=bmu, wsig=wsig, bsig=bsig)


def pack_params(raw, *, param_dtype=jnp.float32):
    """Zero-pad feature dims to 128 lanes and fuse the mu/log_std heads.

    param_dtype=jnp.bfloat16 is the recommended deployment dtype on v6e/v7x
    (bf16-native MXU, half the weight HBM/VMEM bytes); biases stay f32 and are
    added in the f32 accumulator.  Keep H/OUT padding at 128 — do not widen to
    fill the 256-wide MXU (compute is not the binding slot here).
    """
    state_dims, hidden_dim = raw["w1"].shape
    action_dims = raw["wmu"].shape[1]
    S_pad = _round_up(state_dims, LANE)
    H_pad = _round_up(hidden_dim, LANE)
    OUT_pad = _round_up(2 * action_dims, LANE)

    def pad_w(w, rows, cols):
        out = jnp.zeros((rows, cols), param_dtype)
        return out.at[:w.shape[0], :w.shape[1]].set(w.astype(param_dtype))

    def pad_b(b, cols):
        out = jnp.zeros((1, cols), jnp.float32)
        return out.at[0, :b.shape[0]].set(b.astype(jnp.float32))

    w_head = jnp.concatenate([raw["wmu"], raw["wsig"]], axis=1)  # [hidden, 2A]
    b_head = jnp.concatenate([raw["bmu"], raw["bsig"]], axis=0)  # [2A]

    return dict(
        w1=pad_w(raw["w1"], S_pad, H_pad), b1=pad_b(raw["b1"], H_pad),
        w2=pad_w(raw["w2"], H_pad, H_pad), b2=pad_b(raw["b2"], H_pad),
        w_head=pad_w(w_head, H_pad, OUT_pad), b_head=pad_b(b_head, OUT_pad),
    )


# ----------------------------------------------------------------------------
# Test
# ----------------------------------------------------------------------------
if __name__ == "__main__":
    # HalfCheetah-v5: obs dim 17, action dim 6; small hidden for the example.
    B, STATE_DIMS, HIDDEN_DIM, ACTION_DIMS = 8, 17, 32, 6

    key = jax.random.PRNGKey(0)
    k_params, k_state = jax.random.split(key)

    raw = init_raw_params(k_params, STATE_DIMS, HIDDEN_DIM, ACTION_DIMS)
    state = jax.random.normal(k_state, (B, STATE_DIMS), jnp.float32)

    def reference(s):
        x = jnp.maximum(s @ raw["w1"] + raw["b1"], 0.0)
        x = jnp.maximum(x @ raw["w2"] + raw["b2"], 0.0)
        mu = x @ raw["wmu"] + raw["bmu"]
        std = jnp.exp(jnp.clip(x @ raw["wsig"] + raw["bsig"], -20.0, 2.0))
        return mu, std

    mu_ref, std_ref = reference(state)

    # f32 kernel (tight tolerance).
    params_f32 = pack_params(raw, param_dtype=jnp.float32)
    mu, std = actor_policy_forward(state, params_f32, action_dims=ACTION_DIMS)
    jax.block_until_ready((mu, std))
    assert mu.shape == (B, ACTION_DIMS) and std.shape == (B, ACTION_DIMS)
    assert jnp.allclose(mu, mu_ref, atol=1e-5, rtol=1e-5)
    assert jnp.allclose(std, std_ref, atol=1e-5, rtol=1e-5)

    # Odd batch: exercises the row-padding + slicing path.
    state5 = state[:5]
    mu5_ref, std5_ref = reference(state5)
    mu5, std5 = actor_policy_forward(state5, params_f32, action_dims=ACTION_DIMS)
    jax.block_until_ready((mu5, std5))
    assert mu5.shape == (5, ACTION_DIMS) and std5.shape == (5, ACTION_DIMS)
    assert jnp.allclose(mu5, mu5_ref, atol=1e-5, rtol=1e-5)
    assert jnp.allclose(std5, std5_ref, atol=1e-5, rtol=1e-5)

    # bf16-weight kernel (v6e/v7x deployment dtype), f32 accumulation.
    params_bf16 = pack_params(raw, param_dtype=jnp.bfloat16)
    mu16, std16 = actor_policy_forward(state, params_bf16, action_dims=ACTION_DIMS)
    jax.block_until_ready((mu16, std16))
    assert jnp.allclose(mu16, mu_ref, atol=0.05, rtol=0.1)
    assert jnp.allclose(std16, std_ref, atol=0.05, rtol=0.1)

    print("KERNEL_OK")
</pallas_src>

<mosaic_0001>
module attributes {stable_mosaic.version = 11 : i64} {
  func.func @_actor_kernel(%arg0: i32, %arg1: memref<8x17xf32, #tpu.memory_space<vmem>>, %arg2: memref<128x128xf32, #tpu.memory_space<vmem>>, %arg3: memref<1x128xf32, #tpu.memory_space<vmem>>, %arg4: memref<128x128xf32, #tpu.memory_space<vmem>>, %arg5: memref<1x128xf32, #tpu.memory_space<vmem>>, %arg6: memref<128x128xf32, #tpu.memory_space<vmem>>, %arg7: memref<1x128xf32, #tpu.memory_space<vmem>>, %arg8: memref<8x128xf32, #tpu.memory_space<vmem>>, %arg9: memref<8x128xf32, #tpu.memory_space<vmem>>) attributes {dimension_semantics = [#tpu.dimension_semantics<parallel>], iteration_bounds = array<i64: 1>, scalar_prefetch = 0 : i64, scratch_operands = 1 : i64, tpu.core_type = #tpu.core_type<tc>, window_params = [{transform_indices = @transform_0, window_bounds = array<i64: 8, 17>}, {pipeline_mode = #tpu.pipeline_mode<synchronous>, transform_indices = @transform_1, window_bounds = array<i64: 128, 128>}, {pipeline_mode = #tpu.pipeline_mode<synchronous>, transform_indices = @transform_2, window_bounds = array<i64: 1, 128>}, {pipeline_mode = #tpu.pipeline_mode<synchronous>, transform_indices = @transform_3, window_bounds = array<i64: 128, 128>}, {pipeline_mode = #tpu.pipeline_mode<synchronous>, transform_indices = @transform_4, window_bounds = array<i64: 1, 128>}, {pipeline_mode = #tpu.pipeline_mode<synchronous>, transform_indices = @transform_5, window_bounds = array<i64: 128, 128>}, {pipeline_mode = #tpu.pipeline_mode<synchronous>, transform_indices = @transform_6, window_bounds = array<i64: 1, 128>}, {transform_indices = @transform_7, window_bounds = array<i64: 8, 128>}]} {
    %cst = arith.constant 0.000000e+00 : f32
    %0 = vector.broadcast %cst : f32 to vector<8x128xf32>
    %c0 = arith.constant 0 : index
    %c0_0 = arith.constant 0 : index
    %1 = vector.load %arg9[%c0, %c0_0] : memref<8x128xf32, #tpu.memory_space<vmem>>, vector<8x128xf32>
    tpu.vector_store %arg9[%c0, %c0_0], %0 {strides = array<i32>} : memref<8x128xf32, #tpu.memory_space<vmem>>, vector<8x128xf32>,
    %c0_1 = arith.constant 0 : index
    %c0_2 = arith.constant 0 : index
    %2 = vector.load %arg1[%c0_1, %c0_2] : memref<8x17xf32, #tpu.memory_space<vmem>>, vector<8x17xf32>
    %c0_3 = arith.constant 0 : index
    %c0_4 = arith.constant 0 : index
    %3 = vector.load %arg9[%c0_3, %c0_4] : memref<8x128xf32, #tpu.memory_space<vmem>>, vector<8x17xf32>
    tpu.vector_store %arg9[%c0_3, %c0_4], %2 {strides = array<i32>} : memref<8x128xf32, #tpu.memory_space<vmem>>, vector<8x17xf32>,
    %c0_5 = arith.constant 0 : index
    %c0_6 = arith.constant 0 : index
    %4 = vector.load %arg9[%c0_5, %c0_6] : memref<8x128xf32, #tpu.memory_space<vmem>>, vector<8x128xf32>
    %c0_7 = arith.constant 0 : index
    %c0_8 = arith.constant 0 : index
    %5 = vector.load %arg2[%c0_7, %c0_8] : memref<128x128xf32, #tpu.memory_space<vmem>>, vector<128x128xf32>
    %cst_9 = arith.constant dense<0.000000e+00> : vector<8x128xf32>
    %6 = tpu.matmul %4, %5, %cst_9 {dimension_numbers = #tpu.dot_dimension_numbers<[1], [0], [0], [1], [0, 0, 1, 1], [], []>} : vector<8x128xf32>, vector<128x128xf32>, vector<8x128xf32> -> vector<8x128xf32>
    %c0_10 = arith.constant 0 : index
    %c0_11 = arith.constant 0 : index
    %7 = vector.load %arg3[%c0_10, %c0_11] : memref<1x128xf32, #tpu.memory_space<vmem>>, vector<1x128xf32>
    %8 = vector.broadcast %7 : vector<1x128xf32> to vector<8x128xf32>
    %9 = arith.addf %6, %8 : vector<8x128xf32>
    %cst_12 = arith.constant 0.000000e+00 : f32
    %10 = vector.broadcast %cst_12 : f32 to vector<8x128xf32>
    %11 = arith.maximumf %9, %10 : vector<8x128xf32>
    %c0_13 = arith.constant 0 : index
    %c0_14 = arith.constant 0 : index
    %12 = vector.load %arg4[%c0_13, %c0_14] : memref<128x128xf32, #tpu.memory_space<vmem>>, vector<128x128xf32>
    %cst_15 = arith.constant dense<0.000000e+00> : vector<8x128xf32>
    %13 = tpu.matmul %11, %12, %cst_15 {dimension_numbers = #tpu.dot_dimension_numbers<[1], [0], [0], [1], [0, 0, 1, 1], [], []>} : vector<8x128xf32>, vector<128x128xf32>, vector<8x128xf32> -> vector<8x128xf32>
    %c0_16 = arith.constant 0 : index
    %c0_17 = arith.constant 0 : index
    %14 = vector.load %arg5[%c0_16, %c0_17] : memref<1x128xf32, #tpu.memory_space<vmem>>, vector<1x128xf32>
    %15 = vector.broadcast %14 : vector<1x128xf32> to vector<8x128xf32>
    %16 = arith.addf %13, %15 : vector<8x128xf32>
    %cst_18 = arith.constant 0.000000e+00 : f32
    %17 = vector.broadcast %cst_18 : f32 to vector<8x128xf32>
    %18 = arith.maximumf %16, %17 : vector<8x128xf32>
    %c0_19 = arith.constant 0 : index
    %c0_20 = arith.constant 0 : index
    %19 = vector.load %arg6[%c0_19, %c0_20] : memref<128x128xf32, #tpu.memory_space<vmem>>, vector<128x128xf32>
    %cst_21 = arith.constant dense<0.000000e+00> : vector<8x128xf32>
    %20 = tpu.matmul %18, %19, %cst_21 {dimension_numbers = #tpu.dot_dimension_numbers<[1], [0], [0], [1], [0, 0, 1, 1], [], []>} : vector<8x128xf32>, vector<128x128xf32>, vector<8x128xf32> -> vector<8x128xf32>
    %c0_22 = arith.constant 0 : index
    %c0_23 = arith.constant 0 : index
    %21 = vector.load %arg7[%c0_22, %c0_23] : memref<1x128xf32, #tpu.memory_space<vmem>>, vector<1x128xf32>
    %22 = vector.broadcast %21 : vector<1x128xf32> to vector<8x128xf32>
    %23 = arith.addf %20, %22 : vector<8x128xf32>
    %24 = tpu.iota {dimensions = array<i32: 1>} : vector<8x128xi32>
    %cst_24 = arith.constant -2.000000e+01 : f32
    %cst_25 = arith.constant 2.000000e+00 : f32
    %25 = vector.broadcast %cst_24 : f32 to vector<8x128xf32>
    %26 = arith.maximumf %25, %23 : vector<8x128xf32>
    %27 = vector.broadcast %cst_25 : f32 to vector<8x128xf32>
    %28 = arith.minimumf %27, %26 : vector<8x128xf32>
    %29 = math.exp %28 : vector<8x128xf32>
    %c6_i32 = arith.constant 6 : i32
    %30 = vector.broadcast %c6_i32 : i32 to vector<8x128xi32>
    %31 = arith.cmpi sge, %24, %30 : vector<8x128xi32>
    %32 = arith.select %31, %29, %23 : vector<8x128xi1>, vector<8x128xf32>
    %c0_26 = arith.constant 0 : index
    %c0_27 = arith.constant 0 : index
    %33 = vector.load %arg8[%c0_26, %c0_27] : memref<8x128xf32, #tpu.memory_space<vmem>>, vector<8x128xf32>
    tpu.vector_store %arg8[%c0_26, %c0_27], %32 {strides = array<i32>} : memref<8x128xf32, #tpu.memory_space<vmem>>, vector<8x128xf32>,
    return
  }
  func.func @transform_0(%arg0: i32) -> (i32, i32) {
    %c0_i32 = arith.constant 0 : i32
    %c0_i32_0 = arith.constant 0 : i32
    return %arg0, %c0_i32 : i32, i32
  }
  func.func @transform_1(%arg0: i32) -> (i32, i32) {
    %c0_i32 = arith.constant 0 : i32
    %c0_i32_0 = arith.constant 0 : i32
    %c0_i32_1 = arith.constant 0 : i32
    return %c0_i32, %c0_i32_0 : i32, i32
  }
  func.func @transform_2(%arg0: i32) -> (i32, i32) {
    %c0_i32 = arith.constant 0 : i32
    %c0_i32_0 = arith.constant 0 : i32
    %c0_i32_1 = arith.constant 0 : i32
    return %c0_i32, %c0_i32_0 : i32, i32
  }
  func.func @transform_3(%arg0: i32) -> (i32, i32) {
    %c0_i32 = arith.constant 0 : i32
    %c0_i32_0 = arith.constant 0 : i32
    %c0_i32_1 = arith.constant 0 : i32
    return %c0_i32, %c0_i32_0 : i32, i32
  }
  func.func @transform_4(%arg0: i32) -> (i32, i32) {
    %c0_i32 = arith.constant 0 : i32
    %c0_i32_0 = arith.constant 0 : i32
    %c0_i32_1 = arith.constant 0 : i32
    return %c0_i32, %c0_i32_0 : i32, i32
  }
  func.func @transform_5(%arg0: i32) -> (i32, i32) {
    %c0_i32 = arith.constant 0 : i32
    %c0_i32_0 = arith.constant 0 : i32
    %c0_i32_1 = arith.constant 0 : i32
    return %c0_i32, %c0_i32_0 : i32, i32
  }
  func.func @transform_6(%arg0: i32) -> (i32, i32) {
    %c0_i32 = arith.constant 0 : i32
    %c0_i32_0 = arith.constant 0 : i32
    %c0_i32_1 = arith.constant 0 : i32
    return %c0_i32, %c0_i32_0 : i32, i32
  }
  func.func @transform_7(%arg0: i32) -> (i32, i32) {
    %c0_i32 = arith.constant 0 : i32
    %c0_i32_0 = arith.constant 0 : i32
    return %arg0, %c0_i32 : i32, i32
  }
}

</mosaic_0001>

<bundles_post_ra>
// kernel: tpu_custom_call.1
= control target key start
LH: loop header
LB: loop body
LE: loop exit
PB: predicated region body
PF: predicated region fallthrough
CT: control target
= control target key end

     0   :  { %12 = vsyncpa [#allocation4], 0  ;;  %s456_s0 = inlined_call_operand.hbm [shape: f32[8,17], index: 0, kind: input, shape index: {}]   ;;  %s457_s1 = inlined_call_operand.hbm [shape: f32[128,128], index: 1, kind: input, shape index: {}]   ;;  %s458_s2 = inlined_call_operand.vmem [shape: f32[1,128], index: 2, kind: input, shape index: {}]   ;;  %s459_s3 = inlined_call_operand.hbm [shape: f32[128,128], index: 3, kind: input, shape index: {}]   ;;  %s460_s4 = inlined_call_operand.vmem [shape: f32[1,128], index: 4, kind: input, shape index: {}]   ;;  %s461_s5 = inlined_call_operand.hbm [shape: f32[128,128], index: 5, kind: input, shape index: {}]   ;;  %s462_s6 = inlined_call_operand.vmem [shape: f32[1,128], index: 6, kind: input, shape index: {}]   ;;  %s463_s7 = inlined_call_operand.hbm [shape: f32[8,128], index: 7, kind: output, shape index: {}]  }
   0x1   :  { %13 = vsyncpa [#allocation7], 0 }
   0x2   :  { %14 = vsyncpa [#allocation10], 0  ;;  %s31_s26 = sshll.u32 %s457_s1, 4  ;;  %s32_s26 = int_to_ptr.hbm [resolvable:$true] %s31_s26 }
   0x3   :  { %15 = vsyncpa [#allocation5], 0  ;;  %s384_s27 = smov [#allocation6]   ;;  %s21_s8 = sshll.u32 %s456_s0, 4  ;;  %s22_s8 = int_to_ptr.hbm [resolvable:$true] %s21_s8 }
   0x4   :  { %s33_s28 = sshll.u32 %s384_s27, 4  ;;  %s385_s9 = smov 128   ;;  %s34_s28 = int_to_ptr.vmem [resolvable:$true] %s33_s28 }
   0x5   :  { %s386_s10 = smov 8   ;;  %s387_s11 = smov [#allocation3]  }
   0x6   :  { %39 = dma.hbm_to_vmem [thread:$0]  %s32_s26, 2048, %s34_s28, [#allocation7], %s385_s9, %s385_s9, %s386_s10  }
   0x7   :  { %s23_s12 = sshll.u32 %s387_s11, 4  ;;  %s46_s15 = sshll.u32 %s459_s3, 4  ;;  %s24_s12 = int_to_ptr.vmem [resolvable:$true] %s23_s12  ;;  %s47_s15 = int_to_ptr.hbm [resolvable:$true] %s46_s15 }
   0x8   :  { %26 = dma.hbm_to_vmem [thread:$0]  %s22_s8, 128, %s24_s12, [#allocation4]  }
   0x9   :  { %s61_s17 = sshll.u32 %s461_s5, 4  ;;  %s388_s18 = smov [#allocation8]   ;;  %s62_s17 = int_to_ptr.hbm [resolvable:$true] %s61_s17 }
   0xa   :  { %s48_s19 = sshll.u32 %s388_s18, 4  ;;  %s389_s0 = smov [#allocation9]   ;;  %s49_s19 = int_to_ptr.vmem [resolvable:$true] %s48_s19 }
   0xb   :  { %54 = dma.hbm_to_vmem [thread:$0]  %s47_s15, 2048, %s49_s19, [#allocation7], %s385_s9, %s385_s9, %s386_s10  }
   0xc   :  { %s63_s20 = sshll.u32 %s389_s0, 4  ;;  %s64_s20 = int_to_ptr.vmem [resolvable:$true] %s63_s20 }
   0xd   :  { %69 = dma.hbm_to_vmem [thread:$0]  %s62_s17, 2048, %s64_s20, [#allocation10], %s385_s9, %s385_s9, %s386_s10  }
   0xe   :  { %376 = dma.done.wait [#allocation4], 128  }
   0xf   :  { %377 = vsyncadd [#allocation4], 4294967168 }
  0x10   :  { %378 = dma.done.wait [#allocation7], 4096  }
  0x11   :  { %379 = vsyncadd [#allocation7], 4294963200 }
  0x12   :  { %380 = dma.done.wait [#allocation10], 2048  }
  0x13   :  { %381 = vsyncadd [#allocation10], 4294965248  ;;  %v390_v0 = vmov 0.0   ;;  %v108_v1 = vld [vmem:[#allocation6 + $0x78] sm:$0xff]  ;;  %v107_v2 = vld [vmem:[#allocation6 + $0x70] sm:$0xff]  ;;  %vm90_vm0 = vcmask 138240  }
  0x14   :  { %88 = vst [vmem:[#allocation2] sm:$0xff] %v390_v0  ;;  %113 = vmatpush.msra.mxu0 %v108_v1  ;;  %v106_v3 = vld [vmem:[#allocation6 + $0x68] sm:$0xff]  ;;  %v105_v4 = vld [vmem:[#allocation6 + $0x60] sm:$0xff]  ;;  %v89_v5 = vld [vmem:[#allocation3] sm:$0xff]  ;;  %v215_v0 = vlaneseq  ;;  %s391_s24 = smov [#allocation11]   ;;  %s231_s27 = sshll.u32 %s463_s7, 4  ;;  %s232_s27 = int_to_ptr.hbm [resolvable:$true] %s231_s27 }
  0x15   :  { %v149_v6 = vld [vmem:[#allocation8 + $0x78] sm:$0xff]  ;;  %91 = vst.msk [vmem:[#allocation2] sm:$0xff] %vm90_vm0, %v89_v5  ;;  %v148_v8 = vld [vmem:[#allocation8 + $0x70] sm:$0xff]  ;;  %v147_v9 = vld [vmem:[#allocation8 + $0x68] sm:$0xff]  ;;  %s229_s25 = sshll.u32 %s391_s24, 4  ;;  %s230_s25 = int_to_ptr.vmem [resolvable:$true] %s229_s25 }
  0x16   :  { %114 = vmatpush.msra.mxu0 %v107_v2  ;;  %v104_v7 = vld [vmem:[#allocation6 + $0x58] sm:$0xff]  ;;  %154 = vmatpush.msra.mxu1 %v149_v6  ;;  %v103_v10 = vld [vmem:[#allocation6 + $0x50] sm:$0xff]  ;;  %v146_v11 = vld [vmem:[#allocation8 + $0x60] sm:$0xff]  ;;  %v216_v2 = vand.u32 127, %v215_v0 }
  0x17   :  { %v102_v12 = vld [vmem:[#allocation6 + $0x48] sm:$0xff]  ;;  %v145_v13 = vld [vmem:[#allocation8 + $0x58] sm:$0xff]  ;;  %v101_v14 = vld [vmem:[#allocation6 + $0x40] sm:$0xff] }
  0x18   :  { %115 = vmatpush.msra.mxu0 %v106_v3  ;;  %155 = vmatpush.msra.mxu1 %v148_v8  ;;  %v144_v15 = vld [vmem:[#allocation8 + $0x50] sm:$0xff]  ;;  %v100_v16 = vld [vmem:[#allocation6 + $0x38] sm:$0xff]  ;;  %v143_v17 = vld [vmem:[#allocation8 + $0x48] sm:$0xff]  ;;  %vm221_vm1 = vcmp.ge.s32.totalorder %v216_v2, 6 }
  0x19   :  { %v99_v18 = vld [vmem:[#allocation6 + $0x30] sm:$0xff]  ;;  %v142_v19 = vld [vmem:[#allocation8 + $0x40] sm:$0xff]  ;;  %v98_v20 = vld [vmem:[#allocation6 + $0x28] sm:$0xff] }
  0x1a   :  { %116 = vmatpush.msra.mxu0 %v105_v4  ;;  %156 = vmatpush.msra.mxu1 %v147_v9  ;;  %v141_v21 = vld [vmem:[#allocation8 + $0x38] sm:$0xff]  ;;  %v97_v22 = vld [vmem:[#allocation6 + $0x20] sm:$0xff]  ;;  %v140_v23 = vld [vmem:[#allocation8 + $0x30] sm:$0xff] }
  0x1b   :  { %v96_v24 = vld [vmem:[#allocation6 + $0x18] sm:$0xff]  ;;  %v139_v25 = vld [vmem:[#allocation8 + $0x28] sm:$0xff]  ;;  %v95_v26 = vld [vmem:[#allocation6 + $0x10] sm:$0xff] }
  0x1c   :  { %117 = vmatpush.msra.mxu0 %v104_v7  ;;  %157 = vmatpush.msra.mxu1 %v146_v11  ;;  %v138_v27 = vld [vmem:[#allocation8 + $0x20] sm:$0xff]  ;;  %v94_v28 = vld [vmem:[#allocation6 + $0x8] sm:$0xff]  ;;  %v137_v29 = vld [vmem:[#allocation8 + $0x18] sm:$0xff] }
  0x1d   :  { %v93_v30 = vld [vmem:[#allocation6] sm:$0xff]  ;;  %v92_v31 = vld [vmem:[#allocation2] sm:$0xff]  ;;  %v135_v33 = vld [vmem:[#allocation8 + $0x8] sm:$0xff] }
  0x1e   :  { %118 = vmatpush.msra.mxu0 %v103_v10  ;;  %158 = vmatpush.msra.mxu1 %v145_v13  ;;  %v136_v32 = vld [vmem:[#allocation8 + $0x10] sm:$0xff]  ;;  %v134_v34 = vld [vmem:[#allocation8] sm:$0xff]  ;;  %v190_v35 = vld [vmem:[#allocation9 + $0x78] sm:$0xff] }
  0x1f   :  { %v189_v36 = vld [vmem:[#allocation9 + $0x70] sm:$0xff]  ;;  %195 = vmatpush.msra.mxu2 %v190_v35  ;;  %v188_v37 = vld [vmem:[#allocation9 + $0x68] sm:$0xff]  ;;  %v187_v38 = vld [vmem:[#allocation9 + $0x60] sm:$0xff] }
  0x20   :  { %119 = vmatpush.msra.mxu0 %v102_v12  ;;  %159 = vmatpush.msra.mxu1 %v144_v15  ;;  %v186_v39 = vld [vmem:[#allocation9 + $0x58] sm:$0xff]  ;;  %v185_v40 = vld [vmem:[#allocation9 + $0x50] sm:$0xff]  ;;  %v184_v41 = vld [vmem:[#allocation9 + $0x48] sm:$0xff] }
  0x21   :  { %196 = vmatpush.msra.mxu2 %v189_v36  ;;  %v183_v42 = vld [vmem:[#allocation9 + $0x40] sm:$0xff]  ;;  %v182_v43 = vld [vmem:[#allocation9 + $0x38] sm:$0xff]  ;;  %v181_v44 = vld [vmem:[#allocation9 + $0x30] sm:$0xff] }
  0x22   :  { %120 = vmatpush.msra.mxu0 %v101_v14  ;;  %160 = vmatpush.msra.mxu1 %v143_v17  ;;  %v180_v45 = vld [vmem:[#allocation9 + $0x28] sm:$0xff]  ;;  %v179_v46 = vld [vmem:[#allocation9 + $0x20] sm:$0xff]  ;;  %v178_v47 = vld [vmem:[#allocation9 + $0x18] sm:$0xff] }
  0x23   :  { %197 = vmatpush.msra.mxu2 %v188_v37  ;;  %v251_v48 = vld [vmem:[%s458_s2] ss:$0 sm:$0xff]  ;;  %v176_v53 = vld [vmem:[#allocation9 + $0x8] sm:$0xff]  ;;  %v175_v54 = vld [vmem:[#allocation9] sm:$0xff] }
  0x24   :  { %121 = vmatpush.msra.mxu0 %v100_v16  ;;  %161 = vmatpush.msra.mxu1 %v142_v19  ;;  %v177_v52 = vld [vmem:[#allocation9 + $0x10] sm:$0xff] }
  0x25   :  { %198 = vmatpush.msra.mxu2 %v187_v38  ;;  %v252_v55 = vld [vmem:[%s460_s4] ss:$0 sm:$0xff] }
  0x26   :  { %122 = vmatpush.msra.mxu0 %v99_v18  ;;  %162 = vmatpush.msra.mxu1 %v141_v21  ;;  %v253_v59 = vld [vmem:[%s462_s6] ss:$0 sm:$0xff] }
  0x27   :  { %199 = vmatpush.msra.mxu2 %v186_v39 }
  0x28   :  { %123 = vmatpush.msra.mxu0 %v98_v20  ;;  %163 = vmatpush.msra.mxu1 %v140_v23 }
  0x29   :  { %200 = vmatpush.msra.mxu2 %v185_v40 }
  0x2a   :  { %124 = vmatpush.msra.mxu0 %v97_v22  ;;  %164 = vmatpush.msra.mxu1 %v139_v25 }
  0x2b   :  { %201 = vmatpush.msra.mxu2 %v184_v41 }
  0x2c   :  { %125 = vmatpush.msra.mxu0 %v96_v24  ;;  %165 = vmatpush.msra.mxu1 %v138_v27 }
  0x2d   :  { %202 = vmatpush.msra.mxu2 %v183_v42 }
  0x2e   :  { %126 = vmatpush.msra.mxu0 %v95_v26  ;;  %166 = vmatpush.msra.mxu1 %v137_v29 }
  0x2f   :  { %203 = vmatpush.msra.mxu2 %v182_v43 }
  0x30   :  { %127 = vmatpush.msra.mxu0 %v94_v28  ;;  %167 = vmatpush.msra.mxu1 %v136_v32 }
  0x31   :  { %204 = vmatpush.msra.mxu2 %v181_v44 }
  0x32   :  { %128 = vmatpush.msra.mxu0 %v93_v30  ;;  %168 = vmatpush.msra.mxu1 %v135_v33 }
  0x33   :  { %129 = vmatmul.f32.vlgmr.msra.gmra.mxu0 %v92_v31  ;;  %205 = vmatpush.msra.mxu2 %v180_v45 }
  0x34   :  { %169 = vmatpush.msra.mxu1 %v134_v34 }
  0x35   :  { %206 = vmatpush.msra.mxu2 %v179_v46 }
  0x37   :  { %207 = vmatpush.msra.mxu2 %v178_v47 }
  0x39   :  { %208 = vmatpush.msra.mxu2 %v177_v52 }
  0x3b   :  { %209 = vmatpush.msra.mxu2 %v176_v53 }
  0x3d   :  { %210 = vmatpush.msra.mxu2 %v175_v54 }
  0xb0   :  { %v130_v49 = vpop.f32.mrf.mxu0 }
  0xb1   :  { %v131_v50 = vadd.f32 %v251_v48, %v130_v49 }
  0xb3   :  { %v133_v51 = vmax.f32 %v131_v50, 0.0 }
  0xb5   :  { %170 = vmatmul.f32.vlgmr.msra.gmra.mxu1 %v133_v51 }
 0x132   :  { %v171_v56 = vpop.f32.mrf.mxu1 }
 0x133   :  { %v172_v57 = vadd.f32 %v252_v55, %v171_v56 }
 0x135   :  { %v174_v58 = vmax.f32 %v172_v57, 0.0 }
 0x137   :  { %211 = vmatmul.f32.vlgmr.msra.gmra.mxu2 %v174_v58 }
 0x1ba   :  { %v212_v60 = vpop.f32.mrf.mxu2 }
 0x1bb   :  { %v213_v61 = vadd.f32 %v253_v59, %v212_v60 }
 0x1bd   :  { %v217_v62 = vmax.f32 %v213_v61, -20.0 }
 0x1bf   :  { %v218_v63 = vmin.f32 %v217_v62, 2.0 }
 0x1c1   :  { %v219_v1 = vmul.f32 1.442695, %v218_v63 }
 0x1c3   :  { %254 = vpow2.f32 %v219_v1 }
 0x1c9   :  { %v255_v3 = vpop.eup %254 }
 0x1ca   :  { %v222_v4 = vsel %vm221_vm1, %v255_v3, %v213_v61 }
 0x1cb   :  { %223 = vst [vmem:[#allocation11] sm:$0xff] %v222_v4 }
 0x1cc   :  { %234 = dma.vmem_to_hbm [thread:$0]  %s230_s25, 128, %s232_s27, [#allocation5]  }
 0x1cd   :  { %382 = dma.done.wait [#allocation5], 128  }
 0x1ce   :  { %383 = vsyncadd [#allocation5], 4294967168 }
 0x1cf   :  { %239 = vsyncpa [#allocation4], 1 }
 0x1d0   :  { %240 = vsyncpa [#allocation7], 1 }
 0x1d1   :  { %241 = vsyncpa [#allocation10], 1 }
 0x1d2   :  { %242 = vsyncpa [#allocation5], 1 }

</bundles_post_ra>
